<compile_context>
chip_gen: v7x
topology: tpu7x:2x2x1
jax: 0.10.0
libtpu: 0.0.40
codegen_flags: <defaults>
</compile_context>

<pallas_src>
import jax
import jax.numpy as jnp
from jax.experimental import pallas as pl
from jax.experimental.pallas import tpu as pltpu

LANE = 128


def _round_up(x, m):
    return ((x + m - 1) // m) * m


# --------------------------------------------------------------------------- kernel

def _encoder_gru_kernel(ids_ref,   # SMEM: (B, T) int32 token ids
                        emb_ref,   # VMEM: (V, Hp) f32 embedding table (resident)
                        h0_ref,    # VMEM: (B, Hp) f32 initial hidden
                        w_ref,     # VMEM: (2Hp, 4Hp) bf16 fused gate weights (resident)
                        b_ref,     # VMEM: (1, 4Hp) f32 fused gate bias (resident)
                        out_ref,   # VMEM: (T, B, Hp) bf16 per-step GRU outputs
                        hf_ref):   # VMEM: (B, Hp) f32 final hidden
    B, Hp = h0_ref.shape
    T = out_ref.shape[0]

    bias = b_ref[...]                                   # (1, 4Hp) f32, loaded once

    def step(t, h):
        # Per-step embedding gather: B dynamic single-row slices from the
        # VMEM-resident table, driven by SMEM ids (no per-step HBM DMA).
        rows = [emb_ref[pl.ds(ids_ref[bb, t], 1), :] for bb in range(B)]
        x = rows[0] if B == 1 else jnp.concatenate(rows, axis=0)     # (B, Hp) f32

        # Fused [x | h] and a single MXU push: (B, 2Hp) @ (2Hp, 4Hp) -> (B, 4Hp),
        # f32 accumulation. Gate column slots (128-lane aligned): [ r | z | i_n | h_n ].
        xh = jnp.concatenate([x, h], axis=1).astype(jnp.bfloat16)    # (B, 2Hp)
        g = jnp.dot(xh, w_ref[...], preferred_element_type=jnp.float32) + bias

        r = jax.nn.sigmoid(g[:, 0 * Hp:1 * Hp])       # reset gate
        z = jax.nn.sigmoid(g[:, 1 * Hp:2 * Hp])       # update gate
        i_n = g[:, 2 * Hp:3 * Hp]                     # x-side new-gate term (+ b_ih_n)
        h_n = g[:, 3 * Hp:4 * Hp]                     # h-side new-gate term (+ b_hh_n)
        n = jnp.tanh(i_n + r * h_n)                   # PyTorch nn.GRU new gate
        h_new = (1.0 - z) * n + z * h                 # h' = (1 - z) * n + z * h

        out_ref[pl.ds(t, 1), :, :] = h_new[None].astype(out_ref.dtype)
        return h_new                                  # hidden carried in vregs

    # NOTE: the recurrence is strictly serial over t; it lives entirely inside one
    # kernel invocation, so no grid axis can accidentally parallelize it.
    h_final = jax.lax.fori_loop(0, T, step, h0_ref[...])
    hf_ref[...] = h_final


def _encoder_gru_sequence(tokens, h0_p, emb_p, w_cat, b_cat):
    B, T = tokens.shape
    Hp = h0_p.shape[-1]
    V = emb_p.shape[0]

    # VMEM footprint (no grid => everything single-buffered / resident).
    vmem_need = (
        V * Hp * 4 +                        # f32 embedding table
        (2 * Hp) * (4 * Hp) * 2 +           # bf16 fused gate weights
        (4 * Hp) * 4 +                      # f32 fused bias
        2 * _round_up(B, 8) * Hp * 4 +      # h0 + final hidden
        T * _round_up(B, 16) * Hp * 2       # bf16 per-step outputs (layout padded)
    )
    # 64 MiB cap keeps the limit valid on v7x (64 MiB VMEM) as well as v5e/v6e.
    vmem_limit = int(min(max(2 * vmem_need, 16 << 20), 64 << 20))

    cost = pl.CostEstimate(
        flops=int(T * B * (2 * (2 * Hp) * (4 * Hp) + 12 * Hp)),
        transcendentals=int(T * B * 3 * Hp),
        bytes_accessed=int(vmem_need + B * T * 4),
    )

    return pl.pallas_call(
        _encoder_gru_kernel,
        out_shape=(jax.ShapeDtypeStruct((T, B, Hp), jnp.bfloat16),
                   jax.ShapeDtypeStruct((B, Hp), jnp.float32)),
        in_specs=[
            pl.BlockSpec(memory_space=pltpu.MemorySpace.SMEM),   # token ids
            pl.BlockSpec(memory_space=pltpu.MemorySpace.VMEM),   # embedding table
            pl.BlockSpec(memory_space=pltpu.MemorySpace.VMEM),   # initial hidden
            pl.BlockSpec(memory_space=pltpu.MemorySpace.VMEM),   # fused gate weights
            pl.BlockSpec(memory_space=pltpu.MemorySpace.VMEM),   # fused gate bias
        ],
        out_specs=(pl.BlockSpec(memory_space=pltpu.MemorySpace.VMEM),
                   pl.BlockSpec(memory_space=pltpu.MemorySpace.VMEM)),
        compiler_params=pltpu.CompilerParams(vmem_limit_bytes=vmem_limit),
        cost_estimate=cost,
    )(tokens, emb_p, h0_p, w_cat, b_cat)


# --------------------------------------------------------------------------- params

def init_params(key, input_size, hidden_size):
    """PyTorch-shaped params: nn.Embedding(V, H) + nn.GRU(H, H) (gate order r, z, n)."""
    k1, k2, k3, k4, k5 = jax.random.split(key, 5)
    bound = hidden_size ** -0.5
    u = lambda k, shape: jax.random.uniform(k, shape, jnp.float32, -bound, bound)
    return {
        "embedding": jax.random.normal(k1, (input_size, hidden_size), jnp.float32),
        "w_ih": u(k2, (3 * hidden_size, hidden_size)),
        "w_hh": u(k3, (3 * hidden_size, hidden_size)),
        "b_ih": u(k4, (3 * hidden_size,)),
        "b_hh": u(k5, (3 * hidden_size,)),
    }


def prepare_params(params, hidden_size):
    """Convert PyTorch-layout params to kernel layout (lane-padded, gate-fused)."""
    H = hidden_size
    Hp = _round_up(H, LANE)

    def pad_last(x):
        return jnp.pad(x, [(0, 0)] * (x.ndim - 1) + [(0, Hp - H)])

    def gate(w, g):            # (3H, H) gate block, transposed to (H, H) for x @ W^T
        return w[g * H:(g + 1) * H, :].T

    def pad_blk(w):            # (H, H) -> (Hp, Hp), zero pad (exact: pads contribute 0)
        return jnp.pad(w, ((0, Hp - H), (0, Hp - H)))

    zeros = jnp.zeros((Hp, Hp), jnp.float32)
    w_ih, w_hh = params["w_ih"], params["w_hh"]
    # rows [0:Hp] = x contribution, rows [Hp:2Hp] = h contribution
    # cols: [ r | z | i_n (x only) | h_n (h only) ]
    w_top = jnp.concatenate(
        [pad_blk(gate(w_ih, 0)), pad_blk(gate(w_ih, 1)), pad_blk(gate(w_ih, 2)), zeros], axis=1)
    w_bot = jnp.concatenate(
        [pad_blk(gate(w_hh, 0)), pad_blk(gate(w_hh, 1)), zeros, pad_blk(gate(w_hh, 2))], axis=1)
    w_cat = jnp.concatenate([w_top, w_bot], axis=0).astype(jnp.bfloat16)

    b_ih, b_hh = params["b_ih"], params["b_hh"]
    bg = lambda b, g: b[g * H:(g + 1) * H]
    b_cat = jnp.concatenate([
        pad_last(bg(b_ih, 0) + bg(b_hh, 0)),   # r: ih+hh biases fused
        pad_last(bg(b_ih, 1) + bg(b_hh, 1)),   # z: ih+hh biases fused
        pad_last(bg(b_ih, 2)),                 # i_n bias (outside the r*(...) term)
        pad_last(bg(b_hh, 2)),                 # h_n bias (inside the r*(...) term)
    ]).reshape(1, 4 * Hp).astype(jnp.float32)

    # f32 table for robust in-kernel dynamic row slicing; x is cast to bf16 at the
    # matmul, so the effective numerics equal a bf16 table lookup.
    emb_p = pad_last(params["embedding"]).astype(jnp.float32)
    return {"emb_p": emb_p, "w_cat": w_cat, "b_cat": b_cat}


# --------------------------------------------------------------------------- forward

def encoder_rnn_forward(prepared, tokens, hidden):
    """EncoderRNN.forward applied to B sequences of T tokens (B=T=1 == the PyTorch call).

    Returns (output, hidden): output (T, B, H) GRU outputs, hidden (1, B, H) final state.
    """
    H = hidden.shape[-1]
    Hp = prepared["emb_p"].shape[-1]

    tokens = jnp.asarray(tokens, jnp.int32)
    if tokens.ndim == 0:
        tokens = tokens.reshape(1, 1)
    elif tokens.ndim == 1:
        tokens = tokens[None, :]
    B, T = tokens.shape

    h0 = jnp.asarray(hidden, jnp.float32).reshape(-1, H)
    if h0.shape[0] == 1 and B > 1:
        h0 = jnp.broadcast_to(h0, (B, H))
    h0_p = jnp.pad(h0, ((0, 0), (0, Hp - H)))

    outs_p, hfin_p = _encoder_gru_sequence(tokens, h0_p, prepared["emb_p"],
                                           prepared["w_cat"], prepared["b_cat"])
    outs = outs_p[:, :, :H].astype(jnp.float32)        # (T, B, H)
    hfin = hfin_p[:, :H].reshape(1, B, H)              # (1, B, H)
    return outs, hfin


def reference_forward(params, tokens, hidden):
    """Pure-JAX PyTorch-semantics GRU (same bf16-weight / f32-accumulate scheme)."""
    tokens = jnp.atleast_2d(jnp.asarray(tokens, jnp.int32))   # (B, T)
    B, T = tokens.shape
    H = params["embedding"].shape[1]
    emb = params["embedding"].astype(jnp.bfloat16)
    w_ih_t = params["w_ih"].T.astype(jnp.bfloat16)
    w_hh_t = params["w_hh"].T.astype(jnp.bfloat16)
    b_ih = params["b_ih"][None, :]
    b_hh = params["b_hh"][None, :]
    h = jnp.asarray(hidden, jnp.float32).reshape(-1, H)
    if h.shape[0] == 1 and B > 1:
        h = jnp.broadcast_to(h, (B, H))
    outs = []
    for t in range(T):
        x = emb[tokens[:, t]]                                  # (B, H) bf16
        gi = jnp.dot(x, w_ih_t, preferred_element_type=jnp.float32) + b_ih
        gh = jnp.dot(h.astype(jnp.bfloat16), w_hh_t, preferred_element_type=jnp.float32) + b_hh
        r = jax.nn.sigmoid(gi[:, :H] + gh[:, :H])
        z = jax.nn.sigmoid(gi[:, H:2 * H] + gh[:, H:2 * H])
        n = jnp.tanh(gi[:, 2 * H:] + r * gh[:, 2 * H:])
        h = (1.0 - z) * n + z * h
        outs.append(h)
    return jnp.stack(outs, axis=0), h.reshape(1, B, H)


if __name__ == "__main__":
    INPUT_SIZE = 16   # vocabulary size
    HIDDEN = 32       # hidden_size
    SEQ = 8           # timesteps fused into one kernel call
    BATCH = 8         # independent sequences (fills f32 sublanes / MXU rows)

    key = jax.random.PRNGKey(0)
    params = init_params(key, INPUT_SIZE, HIDDEN)
    prepared = prepare_params(params, HIDDEN)

    tokens = jax.random.randint(jax.random.PRNGKey(1), (BATCH, SEQ), 0, INPUT_SIZE,
                                dtype=jnp.int32)
    hidden0 = jnp.zeros((1, BATCH, HIDDEN), jnp.float32)   # EncoderRNN.initHidden per seq

    fwd = jax.jit(encoder_rnn_forward)

    # Batched, full-sequence path (B sequences x T GRU steps in one pallas_call).
    output, hidden = fwd(prepared, tokens, hidden0)
    jax.block_until_ready((output, hidden))
    assert output.shape == (SEQ, BATCH, HIDDEN)
    assert hidden.shape == (1, BATCH, HIDDEN)

    out_expect, hid_expect = reference_forward(params, tokens, hidden0)
    assert jnp.allclose(output, out_expect, atol=2e-2, rtol=2e-2)
    assert jnp.allclose(hidden, hid_expect, atol=2e-2, rtol=2e-2)

    # Single-token, batch=1 call == the original EncoderRNN.forward(input, hidden).
    hidden0_1 = jnp.zeros((1, 1, HIDDEN), jnp.float32)
    out1, hid1 = fwd(prepared, tokens[0, 0], hidden0_1)
    jax.block_until_ready((out1, hid1))
    assert out1.shape == (1, 1, HIDDEN) and hid1.shape == (1, 1, HIDDEN)
    out1_expect, hid1_expect = reference_forward(params, tokens[0, 0], hidden0_1)
    assert jnp.allclose(out1, out1_expect, atol=2e-2, rtol=2e-2)
    assert jnp.allclose(hid1, hid1_expect, atol=2e-2, rtol=2e-2)

    print("KERNEL_OK")
</pallas_src>

<mosaic_0001>
module attributes {stable_mosaic.version = 11 : i64} {
  func.func @_encoder_gru_kernel(%arg0: memref<8x8xi32, #tpu.memory_space<smem>>, %arg1: memref<16x128xf32, #tpu.memory_space<vmem>>, %arg2: memref<8x128xf32, #tpu.memory_space<vmem>>, %arg3: memref<256x512xbf16, #tpu.memory_space<vmem>>, %arg4: memref<1x512xf32, #tpu.memory_space<vmem>>, %arg5: memref<8x8x128xbf16, #tpu.memory_space<vmem>>, %arg6: memref<8x128xf32, #tpu.memory_space<vmem>>) attributes {dimension_semantics = [], scalar_prefetch = 0 : i64, scratch_operands = 0 : i64, tpu.core_type = #tpu.core_type<tc>} {
    %c0 = arith.constant 0 : index
    %c0_0 = arith.constant 0 : index
    %0 = vector.load %arg4[%c0, %c0_0] : memref<1x512xf32, #tpu.memory_space<vmem>>, vector<1x512xf32>
    %c0_1 = arith.constant 0 : index
    %c0_2 = arith.constant 0 : index
    %1 = vector.load %arg2[%c0_1, %c0_2] : memref<8x128xf32, #tpu.memory_space<vmem>>, vector<8x128xf32>
    %c0_i32 = arith.constant 0 : i32
    %c8_i32 = arith.constant 8 : i32
    %2 = arith.addi %c0_i32, %c8_i32 : i32
    %c1_i32 = arith.constant 1 : i32
    %3 = scf.for %arg7 = %c0_i32 to %2 step %c1_i32 iter_args(%arg8 = %1) -> (vector<8x128xf32>)  : i32 {
      %c0_6 = arith.constant 0 : index
      %5 = arith.index_cast %arg7 : i32 to index
      %6 = memref.load %arg0[%c0_6, %5] : memref<8x8xi32, #tpu.memory_space<smem>>
      %7 = arith.index_cast %6 : i32 to index
      %c0_7 = arith.constant 0 : index
      %8 = vector.load %arg1[%7, %c0_7] : memref<16x128xf32, #tpu.memory_space<vmem>>, vector<1x128xf32>
      %c1 = arith.constant 1 : index
      %9 = arith.index_cast %arg7 : i32 to index
      %10 = memref.load %arg0[%c1, %9] : memref<8x8xi32, #tpu.memory_space<smem>>
      %11 = arith.index_cast %10 : i32 to index
      %c0_8 = arith.constant 0 : index
      %12 = vector.load %arg1[%11, %c0_8] : memref<16x128xf32, #tpu.memory_space<vmem>>, vector<1x128xf32>
      %c2 = arith.constant 2 : index
      %13 = arith.index_cast %arg7 : i32 to index
      %14 = memref.load %arg0[%c2, %13] : memref<8x8xi32, #tpu.memory_space<smem>>
      %15 = arith.index_cast %14 : i32 to index
      %c0_9 = arith.constant 0 : index
      %16 = vector.load %arg1[%15, %c0_9] : memref<16x128xf32, #tpu.memory_space<vmem>>, vector<1x128xf32>
      %c3 = arith.constant 3 : index
      %17 = arith.index_cast %arg7 : i32 to index
      %18 = memref.load %arg0[%c3, %17] : memref<8x8xi32, #tpu.memory_space<smem>>
      %19 = arith.index_cast %18 : i32 to index
      %c0_10 = arith.constant 0 : index
      %20 = vector.load %arg1[%19, %c0_10] : memref<16x128xf32, #tpu.memory_space<vmem>>, vector<1x128xf32>
      %c4 = arith.constant 4 : index
      %21 = arith.index_cast %arg7 : i32 to index
      %22 = memref.load %arg0[%c4, %21] : memref<8x8xi32, #tpu.memory_space<smem>>
      %23 = arith.index_cast %22 : i32 to index
      %c0_11 = arith.constant 0 : index
      %24 = vector.load %arg1[%23, %c0_11] : memref<16x128xf32, #tpu.memory_space<vmem>>, vector<1x128xf32>
      %c5 = arith.constant 5 : index
      %25 = arith.index_cast %arg7 : i32 to index
      %26 = memref.load %arg0[%c5, %25] : memref<8x8xi32, #tpu.memory_space<smem>>
      %27 = arith.index_cast %26 : i32 to index
      %c0_12 = arith.constant 0 : index
      %28 = vector.load %arg1[%27, %c0_12] : memref<16x128xf32, #tpu.memory_space<vmem>>, vector<1x128xf32>
      %c6 = arith.constant 6 : index
      %29 = arith.index_cast %arg7 : i32 to index
      %30 = memref.load %arg0[%c6, %29] : memref<8x8xi32, #tpu.memory_space<smem>>
      %31 = arith.index_cast %30 : i32 to index
      %c0_13 = arith.constant 0 : index
      %32 = vector.load %arg1[%31, %c0_13] : memref<16x128xf32, #tpu.memory_space<vmem>>, vector<1x128xf32>
      %c7 = arith.constant 7 : index
      %33 = arith.index_cast %arg7 : i32 to index
      %34 = memref.load %arg0[%c7, %33] : memref<8x8xi32, #tpu.memory_space<smem>>
      %35 = arith.index_cast %34 : i32 to index
      %c0_14 = arith.constant 0 : index
      %36 = vector.load %arg1[%35, %c0_14] : memref<16x128xf32, #tpu.memory_space<vmem>>, vector<1x128xf32>
      %37 = tpu.concatenate %8, %12, %16, %20, %24, %28, %32, %36 in 0 : vector<1x128xf32>, vector<1x128xf32>, vector<1x128xf32>, vector<1x128xf32>, vector<1x128xf32>, vector<1x128xf32>, vector<1x128xf32>, vector<1x128xf32> -> vector<8x128xf32>
      %38 = tpu.concatenate %37, %arg8 in 1 : vector<8x128xf32>, vector<8x128xf32> -> vector<8x256xf32>
      %39 = arith.truncf %38 : vector<8x256xf32> to vector<8x256xbf16>
      %c0_15 = arith.constant 0 : index
      %c0_16 = arith.constant 0 : index
      %40 = vector.load %arg3[%c0_15, %c0_16] : memref<256x512xbf16, #tpu.memory_space<vmem>>, vector<256x512xbf16>
      %cst = arith.constant dense<0.000000e+00> : vector<8x512xf32>
      %41 = tpu.matmul %39, %40, %cst {dimension_numbers = #tpu.dot_dimension_numbers<[1], [0], [0], [1], [0, 0, 1, 1], [], []>} : vector<8x256xbf16>, vector<256x512xbf16>, vector<8x512xf32> -> vector<8x512xf32>
      %42 = vector.broadcast %0 : vector<1x512xf32> to vector<8x512xf32>
      %43 = arith.addf %41, %42 : vector<8x512xf32>
      %44 = vector.extract_strided_slice %43 {offsets = [0, 0], sizes = [8, 128], strides = [1, 1]} : vector<8x512xf32> to vector<8x128xf32>
      %45 = arith.negf %44 : vector<8x128xf32>
      %46 = math.exp %45 : vector<8x128xf32>
      %cst_17 = arith.constant 1.000000e+00 : f32
      %47 = vector.broadcast %cst_17 : f32 to vector<8x128xf32>
      %48 = arith.addf %47, %46 : vector<8x128xf32>
      %49 = arith.divf %47, %48 : vector<8x128xf32>
      %50 = vector.extract_strided_slice %43 {offsets = [0, 128], sizes = [8, 128], strides = [1, 1]} : vector<8x512xf32> to vector<8x128xf32>
      %51 = arith.negf %50 : vector<8x128xf32>
      %52 = math.exp %51 : vector<8x128xf32>
      %cst_18 = arith.constant 1.000000e+00 : f32
      %53 = vector.broadcast %cst_18 : f32 to vector<8x128xf32>
      %54 = arith.addf %53, %52 : vector<8x128xf32>
      %55 = arith.divf %53, %54 : vector<8x128xf32>
      %56 = vector.extract_strided_slice %43 {offsets = [0, 256], sizes = [8, 128], strides = [1, 1]} : vector<8x512xf32> to vector<8x128xf32>
      %57 = vector.extract_strided_slice %43 {offsets = [0, 384], sizes = [8, 128], strides = [1, 1]} : vector<8x512xf32> to vector<8x128xf32>
      %58 = arith.mulf %49, %57 : vector<8x128xf32>
      %59 = arith.addf %56, %58 : vector<8x128xf32>
      %60 = math.tanh %59 : vector<8x128xf32>
      %cst_19 = arith.constant 1.000000e+00 : f32
      %61 = vector.broadcast %cst_19 : f32 to vector<8x128xf32>
      %62 = arith.subf %61, %55 : vector<8x128xf32>
      %63 = arith.mulf %62, %60 : vector<8x128xf32>
      %64 = arith.mulf %55, %arg8 : vector<8x128xf32>
      %65 = arith.addf %63, %64 : vector<8x128xf32>
      %66 = vector.shape_cast %65 : vector<8x128xf32> to vector<1x8x128xf32>
      %67 = arith.truncf %66 : vector<1x8x128xf32> to vector<1x8x128xbf16>
      %68 = arith.index_cast %arg7 : i32 to index
      %c0_20 = arith.constant 0 : index
      %c0_21 = arith.constant 0 : index
      %69 = vector.load %arg5[%68, %c0_20, %c0_21] : memref<8x8x128xbf16, #tpu.memory_space<vmem>>, vector<1x8x128xbf16>
      tpu.vector_store %arg5[%68, %c0_20, %c0_21], %67 {strides = array<i32>} : memref<8x8x128xbf16, #tpu.memory_space<vmem>>, vector<1x8x128xbf16>,
      scf.yield %65 : vector<8x128xf32>
    }
    %c8_i32_3 = arith.constant 8 : i32
    %c0_4 = arith.constant 0 : index
    %c0_5 = arith.constant 0 : index
    %4 = vector.load %arg6[%c0_4, %c0_5] : memref<8x128xf32, #tpu.memory_space<vmem>>, vector<8x128xf32>
    tpu.vector_store %arg6[%c0_4, %c0_5], %3 {strides = array<i32>} : memref<8x128xf32, #tpu.memory_space<vmem>>, vector<8x128xf32>,
    return
  }
}

</mosaic_0001>

<bundles_post_ra>
// kernel: encoder_rnn_forward.1
= control target key start
LH: loop header
LB: loop body
LE: loop exit
PB: predicated region body
PF: predicated region fallthrough
CT: control target
= control target key end

     0   :  { %12 = vsyncpa [#allocation4], 0  ;;  %s1160_s0 = inlined_call_operand.vmem [shape: s32[8,8], index: 0, kind: input, shape index: {}]   ;;  %s1161_s1 = inlined_call_operand.vmem [shape: f32[16,128], index: 1, kind: input, shape index: {}]   ;;  %s1162_s2 = inlined_call_operand.vmem [shape: f32[8,128], index: 2, kind: input, shape index: {}]   ;;  %s1163_s3 = inlined_call_operand.hbm [shape: bf16[256,512], index: 3, kind: input, shape index: {}]   ;;  %s1164_s4 = inlined_call_operand.hbm [shape: f32[1,512], index: 4, kind: input, shape index: {}]   ;;  %s1165_s5 = inlined_call_operand.vmem [shape: bf16[8,8,128], index: 5, kind: output, shape index: {0}]   ;;  %s1166_s6 = inlined_call_operand.vmem [shape: f32[8,128], index: 6, kind: output, shape index: {1}]  }
   0x1   :  { %13 = vsyncpa [#allocation3], 0  ;;  %s21_s23 = sshll.u32 %s1160_s0, 4  ;;  %s22_s23 = int_to_ptr.vmem [resolvable:$true] %s21_s23 }
   0x2   :  { %14 = vsyncpa [#allocation7], 0  ;;  %s911_s24 = scalar_lea.vmem %s22_s23, 128  ;;  %p916_p1 = scmp.lt.s32.totalorder %s22_s23, %s22_s23 }
   0x3   :  { %p912_p0 = scmp.ne.s32.totalorder %s22_s23, %s911_s24  ;;  %p917_p2 = scmp.lt.s32.totalorder %s911_s24, %s911_s24 }
   0x5   :  { %p918_p3 = por %p917_p2, %p916_p1 }
   0x7   :  { %p919_p4 = pnand %p918_p3, %p912_p0 }
   0x9   :  { %922 = shalt.err (!%p919_p4)
}
   0xa   :  { %s989_s25 = smov [#allocation2]   ;;  %s990_s26 = smov [#allocation5]  }
   0xb   :  { %24 = dma.vmem_to_smem %s22_s23, 128, %s989_s25, [#allocation4]  }
   0xc   :  { %s34_s27 = sshll.u32 %s990_s26, 4  ;;  %s923_s30 = scalar_lea.hbm %s1163_s3, 8192  ;;  %s35_s27 = int_to_ptr.vmem [resolvable:$true] %s34_s27 }
   0xd   :  { %p924_p5 = scmp.ne.s32.totalorder %s1163_s3, %s923_s30  ;;  %p927_p6 = scmp.lt.u32.totalorder %s923_s30, %s1163_s3 }
   0xf   :  { %p929_p7 = pnand %p927_p6, %p924_p5 }
  0x11   :  { %932 = shalt.err (!%p929_p7)
}
  0x12   :  { %s933_s10 = scalar_lea.vmem %s35_s27, 8192  ;;  %p938_p9 = scmp.lt.s32.totalorder %s35_s27, %s35_s27 }
  0x13   :  { %p934_p8 = scmp.ne.s32.totalorder %s35_s27, %s933_s10  ;;  %p939_p10 = scmp.lt.s32.totalorder %s933_s10, %s933_s10 }
  0x15   :  { %p940_p11 = por %p939_p10, %p938_p9 }
  0x17   :  { %p941_p12 = pnand %p940_p11, %p934_p8 }
  0x19   :  { %944 = shalt.err (!%p941_p12)
}
  0x1a   :  { %s991_s11 = smov 256   ;;  %s992_s12 = smov 16  }
  0x1b   :  { %40 = dma.hbm_to_vmem [thread:$0]  %s1163_s3, 8192, %s35_s27, [#allocation3], %s991_s11, %s991_s11, %s992_s12  }
  0x1c   :  { %s993_s15 = smov [#allocation6]   ;;  %s945_s19 = scalar_lea.hbm %s1164_s4, 64 }
  0x1d   :  { %s47_s16 = sshll.u32 %s993_s15, 4  ;;  %p946_p13 = scmp.ne.s32.totalorder %s1164_s4, %s945_s19  ;;  %s48_s16 = int_to_ptr.vmem [resolvable:$true] %s47_s16 }
  0x1e   :  { %p949_p0 = scmp.lt.u32.totalorder %s945_s19, %s1164_s4 }
  0x20   :  { %p951_p1 = pnand %p949_p0, %p946_p13 }
  0x22   :  { %954 = shalt.err (!%p951_p1)
}
  0x23   :  { %s955_s24 = scalar_lea.vmem %s48_s16, 64  ;;  %p960_p3 = scmp.lt.s32.totalorder %s48_s16, %s48_s16 }
  0x24   :  { %p956_p2 = scmp.ne.s32.totalorder %s48_s16, %s955_s24  ;;  %p961_p4 = scmp.lt.s32.totalorder %s955_s24, %s955_s24 }
  0x26   :  { %p962_p5 = por %p961_p4, %p960_p3 }
  0x28   :  { %p963_p6 = pnand %p962_p5, %p956_p2 }
  0x2a   :  { %966 = shalt.err (!%p963_p6)
}
  0x2b   :  { %50 = dma.hbm_to_vmem [thread:$0]  %s1164_s4, 64, %s48_s16, [#allocation7]  }
  0x2c   :  { %975 = dma.done.wait [#allocation4], 128  }
  0x2d   :  { %976 = vsyncadd [#allocation4], 4294967168 }
  0x2e   :  { %977 = dma.done.wait [#allocation3], 8192  }
  0x2f   :  { %978 = vsyncadd [#allocation3], 4294959104 }
  0x30   :  { %979 = dma.done.wait [#allocation7], 64  }
  0x31   :  { %980 = vsyncadd [#allocation7], 4294967232 }
  0x32   :  { %60 = sfence }
  0x33   :  { %v1056_v0 = vld [vmem:[#allocation6] sm:$0xf]  ;;  %s1063_s28 = smov 0  }
  0x34   :  { %v62_v1 = vld [vmem:[%s1162_s2] sm:$0xff]  }
  0x35 LB: > { %v805_v2 = vld [vmem:[#allocation5 + $0x4] ss:$16 sps:$4 sm:$0xff]   ;;  %v807_v3 = vld [vmem:[#allocation5] ss:$16 sps:$4 sm:$0xff]   ;;  %v155_v5 = vpack.c.bf16 %v983_v1, %v983_v1  ;;  %v823_v10 = vld [vmem:[#allocation5 + $0xc] ss:$16 sps:$4 sm:$0xff]   ;;  %s987_s28 = sphi %s1063_s28, %s68_s28   ;;  %v983_v1 = vphi %v62_v1, %v1167_v1  }
  0x36   : > { %561 = vmatprep.subr.bf16.mxu0 %v805_v2  ;;  %v808_v4 = vld [vmem:[#allocation5 + $0x24] ss:$16 sps:$4 sm:$0xff]   ;;  %v810_v6 = vld [vmem:[#allocation5 + $0x20] ss:$16 sps:$4 sm:$0xff]   ;;  %v825_v11 = vld [vmem:[#allocation5 + $0x8] ss:$16 sps:$4 sm:$0xff]   ;;  %602 = vmatprep.subr.bf16.mxu1 %v823_v10 }
  0x37   : > { %562 = vmatpush1.bf16.msra.mxu0 %v807_v3  ;;  %v811_v7 = vld [vmem:[#allocation5 + $0x44] ss:$16 sps:$4 sm:$0xff]   ;;  %593 = vmatprep.mubr.bf16.mxu0 %v155_v5  ;;  %v813_v8 = vld [vmem:[#allocation5 + $0x40] ss:$16 sps:$4 sm:$0xff]   ;;  %v829_v13 = vld [vmem:[#allocation5 + $0x2c] ss:$16 sps:$4 sm:$0xff]  }
  0x38   : > { %563 = vmatprep.subr.bf16.mxu0 %v808_v4  ;;  %634 = vmatprep.mubr.bf16.mxu1 %v155_v5  ;;  %v814_v9 = vld [vmem:[#allocation5 + $0x64] ss:$16 sps:$4 sm:$0xff]   ;;  %v816_v12 = vld [vmem:[#allocation5 + $0x60] ss:$16 sps:$4 sm:$0xff]   ;;  %v831_v14 = vld [vmem:[#allocation5 + $0x28] ss:$16 sps:$4 sm:$0xff]  }
  0x39   : > { %603 = vmatpush1.bf16.msra.mxu1 %v825_v11  ;;  %v817_v15 = vld [vmem:[#allocation5 + $0x84] ss:$16 sps:$4 sm:$0xff]   ;;  %s73_s2 = sshra.s32 %s987_s28, 7  ;;  %v819_v16 = vld [vmem:[#allocation5 + $0x80] ss:$16 sps:$4 sm:$0xff]   ;;  %s1078_s30 = sand.u32 127, %s987_s28 }
  0x3a   : > { %604 = vmatprep.subr.bf16.mxu1 %v829_v13  ;;  %v835_v17 = vld [vmem:[#allocation5 + $0x4c] ss:$16 sps:$4 sm:$0xff]   ;;  %v820_v18 = vld [vmem:[#allocation5 + $0xa4] ss:$16 sps:$4 sm:$0xff]   ;;  %v837_v19 = vld [vmem:[#allocation5 + $0x48] ss:$16 sps:$4 sm:$0xff]  }
  0x3b   : > { %564 = vmatpush1.bf16.msra.mxu0 %v810_v6  ;;  %s1074_s4 = sshll.u32 %s73_s2, 7  ;;  %v841_v20 = vld [vmem:[#allocation5 + $0x6c] ss:$16 sps:$4 sm:$0xff]   ;;  %v822_v21 = vld [vmem:[#allocation5 + $0xa0] ss:$16 sps:$4 sm:$0xff]   ;;  %s1085_s10 = sld [smem:[#allocation2 + %s987_s28]] }
  0x3c   : > { %565 = vmatprep.subr.bf16.mxu0 %v811_v7  ;;  %s771_s29 = sadd.s32 128, %s1074_s4  ;;  %v826_v22 = vld [vmem:[#allocation5 + $0xc4] ss:$16 sps:$4 sm:$0xff]   ;;  %v843_v23 = vld [vmem:[#allocation5 + $0x68] ss:$16 sps:$4 sm:$0xff]   ;;  %s773_s7 = sadd.s32 256, %s1074_s4 }
  0x3d   : > { %605 = vmatpush1.bf16.msra.mxu1 %v831_v14  ;;  %v847_v24 = vld [vmem:[#allocation5 + $0x8c] ss:$16 sps:$4 sm:$0xff]   ;;  %v828_v25 = vld [vmem:[#allocation5 + $0xc0] ss:$16 sps:$4 sm:$0xff]   ;;  %s79_s0 = sadd.s32 %s771_s29, %s1078_s30  ;;  %s85_s8 = sadd.s32 %s773_s7, %s1078_s30  ;;  %v832_v26 = vld [vmem:[#allocation5 + $0xe4] ss:$16 sps:$4 sm:$0xff]  }
  0x3e   : > { %606 = vmatprep.subr.bf16.mxu1 %v835_v17  ;;  %v849_v27 = vld [vmem:[#allocation5 + $0x88] ss:$16 sps:$4 sm:$0xff]   ;;  %s775_s9 = sadd.s32 384, %s1074_s4  ;;  %v853_v28 = vld [vmem:[#allocation5 + $0xac] ss:$16 sps:$4 sm:$0xff]   ;;  %s1087_s11 = sld [smem:[#allocation2 + %s79_s0]] }
  0x3f   : > { %566 = vmatpush1.bf16.msra.mxu0 %v813_v8  ;;  %s1089_s12 = sld [smem:[#allocation2 + %s85_s8]]  ;;  %v834_v29 = vld [vmem:[#allocation5 + $0xe0] ss:$16 sps:$4 sm:$0xff]   ;;  %s91_s13 = sadd.s32 %s775_s9, %s1078_s30  ;;  %v838_v30 = vld [vmem:[#allocation5 + $0x104] ss:$16 sps:$4 sm:$0xff]   ;;  %vm140_vm0 = vcmask 1040384  }
  0x40   : > { %567 = vmatprep.subr.bf16.mxu0 %v814_v9  ;;  %s777_s14 = sadd.s32 512, %s1074_s4  ;;  %v855_v31 = vld [vmem:[#allocation5 + $0xa8] ss:$16 sps:$4 sm:$0xff]   ;;  %v859_v32 = vld [vmem:[#allocation5 + $0xcc] ss:$16 sps:$4 sm:$0xff]   ;;  %s779_s15 = sadd.s32 640, %s1074_s4 }
  0x41   : > { %607 = vmatpush1.bf16.msra.mxu1 %v837_v19  ;;  %s1094_s16 = sld [smem:[#allocation2 + %s91_s13]]  ;;  %s97_s17 = sadd.s32 %s777_s14, %s1078_s30  ;;  %v840_v33 = vld [vmem:[#allocation5 + $0x100] ss:$16 sps:$4 sm:$0xff]   ;;  %v844_v34 = vld [vmem:[#allocation5 + $0x124] ss:$16 sps:$4 sm:$0xff]   ;;  %vm142_vm1 = vcmask 1041408  }
  0x42   : > { %608 = vmatprep.subr.bf16.mxu1 %v841_v20  ;;  %v861_v35 = vld [vmem:[#allocation5 + $0xc8] ss:$16 sps:$4 sm:$0xff]   ;;  %s103_s18 = sadd.s32 %s779_s15, %s1078_s30  ;;  %v865_v36 = vld [vmem:[#allocation5 + $0xec] ss:$16 sps:$4 sm:$0xff]   ;;  %s1098_s19 = sld [smem:[#allocation2 + %s97_s17]]  ;;  %vm144_vm2 = vcmask 1042432  }
  0x43   : > { %568 = vmatpush1.bf16.msra.mxu0 %v816_v12  ;;  %s781_s20 = sadd.s32 768, %s1074_s4  ;;  %s71_s23 = scalar_lea.vmem %s1161_s1, %s1085_s10  ;;  %v846_v37 = vld [vmem:[#allocation5 + $0x120] ss:$16 sps:$4 sm:$0xff]   ;;  %v867_v38 = vld [vmem:[#allocation5 + $0xe8] ss:$16 sps:$4 sm:$0xff]   ;;  %vm146_vm3 = vcmask 1043456  }
  0x44   : > { %569 = vmatprep.subr.bf16.mxu0 %v817_v15  ;;  %s81_s25 = scalar_lea.vmem %s1161_s1, %s1087_s11  ;;  %s1113_s29 = sld [smem:[#allocation2 + %s103_s18]]  ;;  %v850_v39 = vld [vmem:[#allocation5 + $0x144] ss:$16 sps:$4 sm:$0xff]   ;;  %v871_v40 = vld [vmem:[#allocation5 + $0x10c] ss:$16 sps:$4 sm:$0xff]   ;;  %vm148_vm4 = vcmask 1044480  }
  0x45   : > { %609 = vmatpush1.bf16.msra.mxu1 %v843_v23  ;;  %s87_s2 = scalar_lea.vmem %s1161_s1, %s1089_s12  ;;  %s109_s7 = sadd.s32 %s781_s20, %s1078_s30  ;;  %v82_v41 = vld [vmem:[%s81_s25] sm:$0x1]  ;;  %v856_v44 = vld [vmem:[#allocation5 + $0x164] ss:$16 sps:$4 sm:$0xff]   ;;  %v873_v47 = vld [vmem:[#allocation5 + $0x108] ss:$16 sps:$4 sm:$0xff]  }
  0x46   : > { %610 = vmatprep.subr.bf16.mxu1 %v847_v24  ;;  %s783_s0 = sadd.s32 896, %s1074_s4  ;;  %v852_v42 = vld [vmem:[#allocation5 + $0x140] ss:$16 sps:$4 sm:$0xff]   ;;  %s1121_s11 = sld [smem:[#allocation2 + %s109_s7]]  ;;  %v120_v46 = vrot.slane %v82_v41, 7  ;;  %vm150_vm5 = vcmask 1045504  }
  0x47   : > { %570 = vmatpush1.bf16.msra.mxu0 %v819_v16  ;;  %v88_v43 = vld [vmem:[%s87_s2] sm:$0x1]  ;;  %s93_s10 = scalar_lea.vmem %s1161_s1, %s1094_s16  ;;  %s115_s12 = sadd.s32 %s783_s0, %s1078_s30  ;;  %v877_v48 = vld [vmem:[#allocation5 + $0x12c] ss:$16 sps:$4 sm:$0xff]   ;;  %v879_v53 = vld [vmem:[#allocation5 + $0x128] ss:$16 sps:$4 sm:$0xff]  }
  0x48   : > { %571 = vmatprep.subr.bf16.mxu0 %v820_v18  ;;  %v72_v45 = vld [vmem:[%s71_s23] sm:$0x1]  ;;  %s99_s14 = scalar_lea.vmem %s1161_s1, %s1098_s19  ;;  %v123_v50 = vrot.slane %v88_v43, 6  ;;  %s1128_s15 = sld [smem:[#allocation2 + %s115_s12]]  ;;  %v862_v56 = vld [vmem:[#allocation5 + $0x184] ss:$16 sps:$4 sm:$0xff]  }
  0x49   : > { %611 = vmatpush1.bf16.msra.mxu1 %v849_v27  ;;  %v94_v49 = vld [vmem:[%s93_s10] sm:$0x1]  ;;  %v141_v52 = vsel %vm140_vm0, %v72_v45, %v120_v46  ;;  %v883_v57 = vld [vmem:[#allocation5 + $0x14c] ss:$16 sps:$4 sm:$0xff]   ;;  %v885_v62 = vld [vmem:[#allocation5 + $0x148] ss:$16 sps:$4 sm:$0xff]  }
  0x4a   : > { %612 = vmatprep.subr.bf16.mxu1 %v853_v28  ;;  %v858_v51 = vld [vmem:[#allocation5 + $0x160] ss:$16 sps:$4 sm:$0xff]   ;;  %s105_s17 = scalar_lea.vmem %s1161_s1, %s1113_s29  ;;  %v126_v55 = vrot.slane %v94_v49, 5  ;;  %v143_v58 = vsel %vm142_vm1, %v141_v52, %v123_v50  ;;  %v868_v2 = vld [vmem:[#allocation5 + $0x1a4] ss:$16 sps:$4 sm:$0xff]   ;;  %vm152_vm6 = vcmask 1046528   ;;  %v221_v28 = vlaneseq }
  0x4b   : > { %572 = vmatpush1.bf16.msra.mxu0 %v822_v21  ;;  %v100_v54 = vld [vmem:[%s99_s14] sm:$0x1]  ;;  %v886_v3 = vld [vmem:[#allocation5 + $0x16c] ss:$16 sps:$4 sm:$0xff]   ;;  %v874_v8 = vld [vmem:[#allocation5 + $0x1c4] ss:$16 sps:$4 sm:$0xff]  }
  0x4c   : > { %573 = vmatprep.subr.bf16.mxu0 %v826_v22  ;;  %v106_v59 = vld [vmem:[%s105_s17] sm:$0x1]  ;;  %s111_s20 = scalar_lea.vmem %s1161_s1, %s1121_s11  ;;  %v129_v60 = vrot.slane %v100_v54, 4  ;;  %v145_v63 = vsel %vm144_vm2, %v143_v58, %v126_v55  ;;  %v888_v9 = vld [vmem:[#allocation5 + $0x168] ss:$16 sps:$4 sm:$0xff]   ;;  %s769_s24 = sshll.u32 %s987_s28, 2 }
  0x4d   : > { %613 = vmatpush1.bf16.msra.mxu1 %v855_v31  ;;  %v864_v61 = vld [vmem:[#allocation5 + $0x180] ss:$16 sps:$4 sm:$0xff]   ;;  %v132_v5 = vrot.slane %v106_v59, 3  ;;  %v889_v12 = vld [vmem:[#allocation5 + $0x18c] ss:$16 sps:$4 sm:$0xff]   ;;  %s664_s26 = scalar_lea.vmem %s1165_s5, %s769_s24  ;;  %s68_s28 = sadd.s32 1, %s987_s28  }
  0x4e   : > { %614 = vmatprep.subr.bf16.mxu1 %v859_v32  ;;  %v112_v4 = vld [vmem:[%s111_s20] sm:$0x1]  ;;  %s117_s23 = scalar_lea.vmem %s1161_s1, %s1128_s15  ;;  %v147_v6 = vsel %vm146_vm3, %v145_v63, %v129_v60  ;;  %v891_v16 = vld [vmem:[#allocation5 + $0x188] ss:$16 sps:$4 sm:$0xff]   ;;  %v880_v17 = vld [vmem:[#allocation5 + $0x1e4] ss:$16 sps:$4 sm:$0xff]  }
  0x4f   : > { %574 = vmatpush1.bf16.msra.mxu0 %v828_v25  ;;  %v870_v7 = vld [vmem:[#allocation5 + $0x1a0] ss:$16 sps:$4 sm:$0xff]   ;;  %v135_v11 = vrot.slane %v112_v4, 2  ;;  %v149_v13 = vsel %vm148_vm4, %v147_v6, %v132_v5  ;;  %v892_v19 = vld [vmem:[#allocation5 + $0x1ac] ss:$16 sps:$4 sm:$0xff]   ;;  %p65_p7 = scmp.ge.s32.totalorder %s68_s28, 8  }
  0x50   : > { %575 = vmatprep.subr.bf16.mxu0 %v832_v26  ;;  %v118_v10 = vld [vmem:[%s117_s23] sm:$0x1]  ;;  %v894_v22 = vld [vmem:[#allocation5 + $0x1a8] ss:$16 sps:$4 sm:$0xff]   ;;  %v895_v23 = vld [vmem:[#allocation5 + $0x1cc] ss:$16 sps:$4 sm:$0xff]  }
  0x51   : > { %615 = vmatpush1.bf16.msra.mxu1 %v861_v35  ;;  %v876_v14 = vld [vmem:[#allocation5 + $0x1c0] ss:$16 sps:$4 sm:$0xff]   ;;  %v138_v15 = vrot.slane %v118_v10, 1  ;;  %v151_v18 = vsel %vm150_vm5, %v149_v13, %v135_v11  ;;  %v897_v25 = vld [vmem:[#allocation5 + $0x1c8] ss:$16 sps:$4 sm:$0xff]  }
  0x52   : > { %616 = vmatprep.subr.bf16.mxu1 %v865_v36  ;;  %v882_v20 = vld [vmem:[#allocation5 + $0x1e0] ss:$16 sps:$4 sm:$0xff]   ;;  %v898_v26 = vld [vmem:[#allocation5 + $0x1ec] ss:$16 sps:$4 sm:$0xff]   ;;  %v900_v27 = vld [vmem:[#allocation5 + $0x1e8] ss:$16 sps:$4 sm:$0xff]  }
  0x53   : > { %576 = vmatpush1.bf16.msra.mxu0 %v834_v29  ;;  %v153_v21 = vsel %vm152_vm6, %v151_v18, %v138_v15  ;;  %v222_v29 = vshrl.u32 %v221_v28, 7 }
  0x54   : > { %577 = vmatprep.subr.bf16.mxu0 %v838_v30  ;;  %v154_v24 = vpack.c.bf16 %v153_v21, %v153_v21 }
  0x55   : > { %617 = vmatpush1.bf16.msra.mxu1 %v867_v38  ;;  %v223_v30 = vsub.s32 0, %v222_v29  ;;  %v227_v31 = vsub.s32 1, %v222_v29  ;;  %v231_v49 = vsub.s32 2, %v222_v29 }
  0x56   : > { %618 = vmatprep.subr.bf16.mxu1 %v871_v40 }
  0x57   : > { %578 = vmatpush1.bf16.msra.mxu0 %v840_v33  ;;  %v224_v32 = vrot.slane %v1056_v0, %v223_v30 }
  0x58   : > { %579 = vmatprep.subr.bf16.mxu0 %v844_v34  ;;  %v228_v34 = vrot.slane %v1056_v0, %v227_v31 }
  0x59   : > { %619 = vmatpush1.bf16.msra.mxu1 %v873_v47 }
  0x5a   : > { %620 = vmatprep.subr.bf16.mxu1 %v877_v48  ;;  %v235_v48 = vsub.s32 3, %v222_v29 }
  0x5b   : > { %580 = vmatpush1.bf16.msra.mxu0 %v846_v37 }
  0x5c   : > { %581 = vmatprep.subr.bf16.mxu0 %v850_v39  ;;  %v236_v50 = vrot.slane %v1056_v0, %v235_v48 }
  0x5d   : > { %621 = vmatpush1.bf16.msra.mxu1 %v879_v53  ;;  %v232_v53 = vrot.slane %v1056_v0, %v231_v49 }
  0x5e   : > { %622 = vmatprep.subr.bf16.mxu1 %v883_v57 }
  0x5f   : > { %582 = vmatpush1.bf16.msra.mxu0 %v852_v42 }
  0x60   : > { %583 = vmatprep.subr.bf16.mxu0 %v856_v44 }
  0x61   : > { %623 = vmatpush1.bf16.msra.mxu1 %v885_v62 }
  0x62   : > { %624 = vmatprep.subr.bf16.mxu1 %v886_v3 }
  0x63   : > { %584 = vmatpush1.bf16.msra.mxu0 %v858_v51 }
  0x64   : > { %585 = vmatprep.subr.bf16.mxu0 %v862_v56 }
  0x65   : > { %625 = vmatpush1.bf16.msra.mxu1 %v888_v9 }
  0x66   : > { %626 = vmatprep.subr.bf16.mxu1 %v889_v12 }
  0x67   : > { %586 = vmatpush1.bf16.msra.mxu0 %v864_v61 }
  0x68   : > { %587 = vmatprep.subr.bf16.mxu0 %v868_v2 }
  0x69   : > { %627 = vmatpush1.bf16.msra.mxu1 %v891_v16 }
  0x6a   : > { %628 = vmatprep.subr.bf16.mxu1 %v892_v19 }
  0x6b   : > { %588 = vmatpush1.bf16.msra.mxu0 %v870_v7 }
  0x6c   : > { %589 = vmatprep.subr.bf16.mxu0 %v874_v8 }
  0x6d   : > { %629 = vmatpush1.bf16.msra.mxu1 %v894_v22 }
  0x6e   : > { %630 = vmatprep.subr.bf16.mxu1 %v895_v23 }
  0x6f   : > { %590 = vmatpush1.bf16.msra.mxu0 %v876_v14 }
  0x70   : > { %591 = vmatprep.subr.bf16.mxu0 %v880_v17 }
  0x71   : > { %631 = vmatpush1.bf16.msra.mxu1 %v897_v25 }
  0x72   : > { %632 = vmatprep.subr.bf16.mxu1 %v898_v26 }
  0x73   : > { %592 = vmatpush1.bf16.msra.mxu0 %v882_v20 }
  0x75   : > { %633 = vmatpush1.bf16.msra.mxu1 %v900_v27 }
  0x76   : > { %594 = vmatmul.mubr.bf16.vlgmr.msra.gmra.mrb[0].mxu0 %v154_v24 }
  0x78   : > { %635 = vmatmul.mubr.bf16.vlgmr.msra.gmra.mrb[0].mxu1 %v154_v24 }
 0x149   : > { %v595_v33 = vpop.f32.mrb[0].mxu0 }
 0x14a   : > { %v596_v35 = vadd.f32 %v595_v33, %v224_v32  ;;  %v597_v36 = vpop.f32.mrb[1].mxu0 }
 0x14b   : > { %v599_v37 = vpop.f32.mrb[2].mxu0  ;;  %v598_v40 = vadd.f32 %v597_v36, %v228_v34  ;;  %v636_v42 = vpop.f32.mrb[0].mxu1 }
 0x14c   : > { %v767_v38 = vmul.f32 -1.442695, %v596_v35  ;;  %v600_v39 = vpop.f32.mrb[3].mxu0  ;;  %v638_v43 = vpop.f32.mrb[1].mxu1  ;;  %v637_v56 = vadd.f32 %v636_v42, %v232_v53 }
 0x14d   : > { %v768_v41 = vmul.f32 -1.442695, %v598_v40  ;;  %v640_v44 = vpop.f32.mrb[2].mxu1  ;;  %v639_v54 = vadd.f32 %v638_v43, %v236_v50 }
 0x14e   : > { %901 = vpow2.f32 %v767_v38  ;;  %v641_v45 = vpop.f32.mrb[3].mxu1 }
 0x14f   : > { %903 = vpow2.f32 %v768_v41 }
 0x158   : > { %v902_v46 = vpop.eup %901 }
 0x159   : > { %v646_v47 = vadd.f32 1.0, %v902_v46  ;;  %v904_v51 = vpop.eup %903 }
 0x15a   : > { %v652_v52 = vadd.f32 1.0, %v904_v51 }
 0x15b   : > { %905 = vrcp.f32 %v646_v47 }
 0x15c   : > { %907 = vrcp.f32 %v652_v52 }
 0x165   : > { %v906_v55 = vpop.eup %905 }
 0x166   : > { %v655_v57 = vmul.f32 %v906_v55, %v639_v54  ;;  %v908_v59 = vpop.eup %907 }
 0x167   : > { %v658_v60 = vsub.f32 1.0, %v908_v59  ;;  %v660_v62 = vmul.f32 %v983_v1, %v908_v59 }
 0x168   : > { %v656_v58 = vadd.f32 %v655_v57, %v637_v56 }
 0x16a   : > { %909 = vtanh.f32 %v656_v58 }
 0x174   : > { %v910_v61 = vpop.eup %909 }
 0x175   : > { %v659_v63 = vmul.f32 %v910_v61, %v658_v60  ;;  %67 = sbr.rel (!%p65_p7) target bundleno = 53 (0x35), region = 76 }
 0x177   : > { %v661_v2 = vadd.f32 %v660_v62, %v659_v63  }
 0x179   : > { %v662_v3 = vpack.c.bf16 %v661_v2, %v661_v2  ;;  %v1167_v1 = vmov %v661_v2  ;;  %666 = vst [vmem:[%s1166_s6] sm:$0xff] (%p65_p7), %v661_v2 }
 0x17b   : > { %665 = vst [vmem:[%s664_s26] sm:$0xf] %v662_v3 }
 0x17c   :  { %675 = vsyncpa [#allocation3], 1 }
 0x17d   :  { %676 = vsyncpa [#allocation7], 1 }
 0x17e   :  { %677 = vsyncpa [#allocation4], 1 }

</bundles_post_ra>
